<compile_context>
chip_gen: v7x
topology: tpu7x:2x2x1
jax: 0.10.0
libtpu: 0.0.40
codegen_flags: <defaults>
</compile_context>

<pallas_src>
import functools

import jax
import jax.numpy as jnp
from jax import lax
from jax.experimental import pallas as pl
from jax.experimental.pallas import tpu as pltpu


def _isomax_kernel(inv_temp_ref, f_sq_ref, p_sq_ref, f_ref, p_ref, o_ref, acc_ref):
    # inv_temp_ref : SMEM (1, 1) f32 scalar
    # f_sq_ref     : (tb, 1)  f32   p_sq_ref : (1, tc) f32
    # f_ref        : (tb, tk) native dtype    p_ref : (tc, tk) native dtype
    # o_ref        : (tb, tc) out dtype       acc_ref : (tb, tc) f32 scratch
    k = pl.program_id(2)

    @pl.when(k == 0)
    def _():
        acc_ref[...] = jnp.zeros_like(acc_ref)

    # f @ p^T in native dtype (bf16 -> single-pass MXU), f32 accumulation.
    # Contract the shared last (lane) axis of both tiles -- same pattern as
    # flash-attention's 'qd,kd->qk', no in-kernel transpose of the prototype
    # tile is required.
    acc_ref[...] += lax.dot_general(
        f_ref[...], p_ref[...],
        dimension_numbers=(((1,), (1,)), ((), ())),
        preferred_element_type=jnp.float32,
    )

    @pl.when(k == pl.num_programs(2) - 1)
    def _():
        # ||f||^2 + ||p||^2 - 2 f.p, clamped against fp cancellation.
        d2 = f_sq_ref[...] + p_sq_ref[...] - 2.0 * acc_ref[...]
        d2 = jnp.maximum(d2, 0.0)
        o_ref[...] = (-jnp.sqrt(d2) * inv_temp_ref[0, 0]).astype(o_ref.dtype)


def _round_up(x, m):
    return ((x + m - 1) // m) * m


def isomax_forward(features, prototypes, *, temperature=1.0,
                   tile_b=512, tile_c=256, tile_k=512,
                   out_dtype=jnp.float32):
    """logits = -cdist(features, prototypes) / temperature via Pallas."""
    B, F = features.shape
    C, F2 = prototypes.shape
    assert F == F2, "feature dims must match"

    # Squared row norms, computed ONCE in fp32 in the wrapper (keeps the grid
    # epilogue free of redundant reductions and of the (tc,1)->(1,tc) relayout).
    f_sq = jnp.sum(features.astype(jnp.float32) ** 2, axis=-1, keepdims=True)        # (B, 1)
    p_sq = jnp.sum(prototypes.astype(jnp.float32) ** 2, axis=-1, keepdims=True).T    # (1, C)

    # Tile selection: clamp for small problems while keeping (8, 128) alignment.
    tb = min(tile_b, _round_up(B, 8))
    tc = min(tile_c, _round_up(C, 128))
    if F <= max(tile_k, 1024):
        tk, Fpad = F, F                       # single full-F block, no F padding
    else:
        tk = tile_k                           # multiple of 128
        Fpad = _round_up(F, tk)

    Bp = _round_up(B, tb)
    Cp = _round_up(C, tc)

    # Zero-pad to tile multiples (zeros contribute 0 to the dot and the norms;
    # padded rows/cols are sliced off below).
    # TODO(synk): use Pallas edge-block masking instead of jnp.pad to save the
    # extra HBM pass when B/C are large and non-divisible.
    if (Bp, Fpad) != (B, F):
        features = jnp.pad(features, ((0, Bp - B), (0, Fpad - F)))
        f_sq = jnp.pad(f_sq, ((0, Bp - B), (0, 0)))
    if (Cp, Fpad) != (C, F):
        prototypes = jnp.pad(prototypes, ((0, Cp - C), (0, Fpad - F)))
        p_sq = jnp.pad(p_sq, ((0, 0), (0, Cp - C)))

    nb, nc, nk = Bp // tb, Cp // tc, Fpad // tk

    # Runtime scalar (no recompile per temperature; jit-traceable).
    inv_temp = (1.0 / jnp.asarray(temperature, jnp.float32)).reshape((1, 1))

    in_bytes = jnp.dtype(features.dtype).itemsize
    out_bytes = jnp.dtype(out_dtype).itemsize

    # Explicit VMEM budget (double-buffered inputs/output + accumulator).
    vmem_bytes = (2 * ((tb + tc) * tk * in_bytes + tb * tc * out_bytes)
                  + tb * tc * 4 + 2 * (tb + tc) * 4)
    vmem_limit = int(min(max(2 * vmem_bytes, 16 << 20), 96 << 20))

    cost = pl.CostEstimate(
        flops=2 * Bp * Cp * Fpad,
        transcendentals=Bp * Cp,                                    # sqrt epilogue
        bytes_accessed=(nc * Bp * Fpad + nb * Cp * Fpad) * in_bytes
                       + Bp * Cp * out_bytes,
    )

    out = pl.pallas_call(
        _isomax_kernel,
        out_shape=jax.ShapeDtypeStruct((Bp, Cp), out_dtype),
        grid_spec=pltpu.PrefetchScalarGridSpec(
            num_scalar_prefetch=0,
            # Class axis inner relative to batch: the feature tile's index_map
            # ignores j, so it stays resident while prototype tiles stream;
            # the F (reduction) axis is innermost.
            grid=(nb, nc, nk),
            in_specs=[
                pl.BlockSpec(memory_space=pltpu.MemorySpace.SMEM),   # inv_temp
                pl.BlockSpec((tb, 1), lambda i, j, k: (i, 0)),       # ||f||^2
                pl.BlockSpec((1, tc), lambda i, j, k: (0, j)),       # ||p||^2
                pl.BlockSpec((tb, tk), lambda i, j, k: (i, k)),      # features
                pl.BlockSpec((tc, tk), lambda i, j, k: (j, k)),      # prototypes
            ],
            out_specs=pl.BlockSpec((tb, tc), lambda i, j, k: (i, j)),
            scratch_shapes=[pltpu.VMEM((tb, tc), jnp.float32)],
        ),
        compiler_params=pltpu.CompilerParams(
            dimension_semantics=("parallel", "parallel", "arbitrary"),
            vmem_limit_bytes=vmem_limit),
        cost_estimate=cost,
    )(inv_temp, f_sq, p_sq, features, prototypes)

    if (Bp, Cp) != (B, C):
        out = out[:B, :C]
    return out


def isomax_reference(features, prototypes, *, temperature=1.0):
    # Exact (elementwise) Euclidean distance, like torch.cdist with
    # compute_mode='donot_use_mm_for_euclid_dist'.
    f = features.astype(jnp.float32)
    p = prototypes.astype(jnp.float32)
    diff = f[:, None, :] - p[None, :, :]
    dist = jnp.sqrt(jnp.sum(diff * diff, axis=-1))
    return -dist / temperature


if __name__ == "__main__":
    # Small shapes consistent with the module: batch=6, num_features=32,
    # num_classes=48 (non-divisible B/C exercise the padding path).
    B, FEAT, CLS = 6, 32, 48
    key = jax.random.PRNGKey(0)
    k1, k2 = jax.random.split(key)

    features = jax.random.normal(k1, (B, FEAT), dtype=jnp.float32)
    # The module inits prototypes to 0.0 (degenerate: all distances == ||f||);
    # use random "trained" prototypes so the correctness check is meaningful.
    prototypes = jax.random.normal(k2, (CLS, FEAT), dtype=jnp.float32)

    out = isomax_forward(features, prototypes, temperature=1.0)
    jax.block_until_ready(out)
    ref = isomax_reference(features, prototypes, temperature=1.0)
    assert out.shape == (B, CLS)
    assert jnp.allclose(out, ref, atol=1e-4, rtol=1e-4), "mismatch vs reference"

    # Module's actual init (zero prototypes) and temperature != 1.
    zero_protos = jnp.zeros((CLS, FEAT), dtype=jnp.float32)
    out0 = isomax_forward(features, zero_protos, temperature=2.0)
    jax.block_until_ready(out0)
    ref0 = isomax_reference(features, zero_protos, temperature=2.0)
    assert jnp.allclose(out0, ref0, atol=1e-4, rtol=1e-4), "mismatch (zero protos)"

    # bf16 inputs: native-dtype MXU path (looser tolerance for bf16 rounding).
    out_bf = isomax_forward(features.astype(jnp.bfloat16),
                            prototypes.astype(jnp.bfloat16),
                            temperature=1.0)
    jax.block_until_ready(out_bf)
    assert jnp.allclose(out_bf, ref, atol=1e-1, rtol=5e-2), "mismatch (bf16)"

    print("KERNEL_OK")
</pallas_src>

<mosaic_0001>
module attributes {stable_mosaic.version = 11 : i64} {
  func.func @_isomax_kernel(%arg0: i32, %arg1: i32, %arg2: i32, %arg3: memref<1x1xf32, #tpu.memory_space<smem>>, %arg4: memref<8x1xf32, #tpu.memory_space<vmem>>, %arg5: memref<1x128xf32, #tpu.memory_space<vmem>>, %arg6: memref<8x32xf32, #tpu.memory_space<vmem>>, %arg7: memref<128x32xf32, #tpu.memory_space<vmem>>, %arg8: memref<8x128xf32, #tpu.memory_space<vmem>>, %arg9: memref<8x128xf32, #tpu.memory_space<vmem>>) attributes {dimension_semantics = [#tpu.dimension_semantics<parallel>, #tpu.dimension_semantics<parallel>, #tpu.dimension_semantics<arbitrary>], iteration_bounds = array<i64: 1, 1, 1>, scalar_prefetch = 0 : i64, scratch_operands = 1 : i64, tpu.core_type = #tpu.core_type<tc>, window_params = [{transform_indices = @transform_0, window_bounds = array<i64: 1, 1>}, {transform_indices = @transform_1, window_bounds = array<i64: 8, 1>}, {transform_indices = @transform_2, window_bounds = array<i64: 1, 128>}, {transform_indices = @transform_3, window_bounds = array<i64: 8, 32>}, {transform_indices = @transform_4, window_bounds = array<i64: 128, 32>}, {transform_indices = @transform_5, window_bounds = array<i64: 8, 128>}]} {
    %c0_i32 = arith.constant 0 : i32
    %0 = arith.cmpi eq, %arg2, %c0_i32 : i32
    %1 = arith.extui %0 : i1 to i32
    %c0_i32_0 = arith.constant 0 : i32
    %2 = arith.cmpi ne, %1, %c0_i32_0 : i32
    scf.if %2 {
      %cst_10 = arith.constant 0.000000e+00 : f32
      %12 = vector.broadcast %cst_10 : f32 to vector<8x128xf32>
      %c0_11 = arith.constant 0 : index
      %c0_12 = arith.constant 0 : index
      %13 = vector.load %arg9[%c0_11, %c0_12] : memref<8x128xf32, #tpu.memory_space<vmem>>, vector<8x128xf32>
      tpu.vector_store %arg9[%c0_11, %c0_12], %12 {strides = array<i32>} : memref<8x128xf32, #tpu.memory_space<vmem>>, vector<8x128xf32>,
    } else {
    }
    %c0 = arith.constant 0 : index
    %c0_1 = arith.constant 0 : index
    %3 = vector.load %arg9[%c0, %c0_1] : memref<8x128xf32, #tpu.memory_space<vmem>>, vector<8x128xf32>
    %c0_2 = arith.constant 0 : index
    %c0_3 = arith.constant 0 : index
    %4 = vector.load %arg6[%c0_2, %c0_3] : memref<8x32xf32, #tpu.memory_space<vmem>>, vector<8x32xf32>
    %c0_4 = arith.constant 0 : index
    %c0_5 = arith.constant 0 : index
    %5 = vector.load %arg7[%c0_4, %c0_5] : memref<128x32xf32, #tpu.memory_space<vmem>>, vector<128x32xf32>
    %cst = arith.constant dense<0.000000e+00> : vector<8x128xf32>
    %6 = tpu.matmul %4, %5, %cst {dimension_numbers = #tpu.dot_dimension_numbers<[1], [1], [0], [0], [0, 0, 1, 0], [], []>} : vector<8x32xf32>, vector<128x32xf32>, vector<8x128xf32> -> vector<8x128xf32>
    %7 = arith.addf %3, %6 : vector<8x128xf32>
    %c0_6 = arith.constant 0 : index
    %c0_7 = arith.constant 0 : index
    %8 = vector.load %arg9[%c0_6, %c0_7] : memref<8x128xf32, #tpu.memory_space<vmem>>, vector<8x128xf32>
    tpu.vector_store %arg9[%c0_6, %c0_7], %7 {strides = array<i32>} : memref<8x128xf32, #tpu.memory_space<vmem>>, vector<8x128xf32>,
    %c0_i32_8 = arith.constant 0 : i32
    %9 = arith.cmpi eq, %arg2, %c0_i32_8 : i32
    %10 = arith.extui %9 : i1 to i32
    %c0_i32_9 = arith.constant 0 : i32
    %11 = arith.cmpi ne, %10, %c0_i32_9 : i32
    scf.if %11 {
      %c0_10 = arith.constant 0 : index
      %c0_11 = arith.constant 0 : index
      %12 = vector.load %arg4[%c0_10, %c0_11] : memref<8x1xf32, #tpu.memory_space<vmem>>, vector<8x1xf32>
      %c0_12 = arith.constant 0 : index
      %c0_13 = arith.constant 0 : index
      %13 = vector.load %arg5[%c0_12, %c0_13] : memref<1x128xf32, #tpu.memory_space<vmem>>, vector<1x128xf32>
      %14 = vector.broadcast %12 : vector<8x1xf32> to vector<8x128xf32>
      %15 = vector.broadcast %13 : vector<1x128xf32> to vector<8x128xf32>
      %16 = arith.addf %14, %15 : vector<8x128xf32>
      %c0_14 = arith.constant 0 : index
      %c0_15 = arith.constant 0 : index
      %17 = vector.load %arg9[%c0_14, %c0_15] : memref<8x128xf32, #tpu.memory_space<vmem>>, vector<8x128xf32>
      %cst_16 = arith.constant 2.000000e+00 : f32
      %18 = vector.broadcast %cst_16 : f32 to vector<8x128xf32>
      %19 = arith.mulf %18, %17 : vector<8x128xf32>
      %20 = arith.subf %16, %19 : vector<8x128xf32>
      %cst_17 = arith.constant 0.000000e+00 : f32
      %21 = vector.broadcast %cst_17 : f32 to vector<8x128xf32>
      %22 = arith.maximumf %20, %21 : vector<8x128xf32>
      %23 = math.sqrt %22 : vector<8x128xf32>
      %cst_18 = arith.constant 0.000000e+00 : f32
      %24 = vector.broadcast %cst_18 : f32 to vector<8x128xf32>
      %25 = arith.subf %24, %23 : vector<8x128xf32>
      %c0_19 = arith.constant 0 : index
      %c0_20 = arith.constant 0 : index
      %26 = memref.load %arg3[%c0_19, %c0_20] : memref<1x1xf32, #tpu.memory_space<smem>>
      %27 = vector.broadcast %26 : f32 to vector<8x128xf32>
      %28 = arith.mulf %25, %27 : vector<8x128xf32>
      %c0_21 = arith.constant 0 : index
      %c0_22 = arith.constant 0 : index
      %29 = vector.load %arg8[%c0_21, %c0_22] : memref<8x128xf32, #tpu.memory_space<vmem>>, vector<8x128xf32>
      tpu.vector_store %arg8[%c0_21, %c0_22], %28 {strides = array<i32>} : memref<8x128xf32, #tpu.memory_space<vmem>>, vector<8x128xf32>,
    } else {
    }
    return
  }
  func.func @transform_0(%arg0: i32, %arg1: i32, %arg2: i32) -> (i32, i32) {
    %c0_i32 = arith.constant 0 : i32
    %c0_i32_0 = arith.constant 0 : i32
    %c0_i32_1 = arith.constant 0 : i32
    return %c0_i32, %c0_i32_0 : i32, i32
  }
  func.func @transform_1(%arg0: i32, %arg1: i32, %arg2: i32) -> (i32, i32) {
    %c0_i32 = arith.constant 0 : i32
    %c0_i32_0 = arith.constant 0 : i32
    return %arg0, %c0_i32 : i32, i32
  }
  func.func @transform_2(%arg0: i32, %arg1: i32, %arg2: i32) -> (i32, i32) {
    %c0_i32 = arith.constant 0 : i32
    %c0_i32_0 = arith.constant 0 : i32
    return %c0_i32, %arg1 : i32, i32
  }
  func.func @transform_3(%arg0: i32, %arg1: i32, %arg2: i32) -> (i32, i32) {
    %c0_i32 = arith.constant 0 : i32
    return %arg0, %arg2 : i32, i32
  }
  func.func @transform_4(%arg0: i32, %arg1: i32, %arg2: i32) -> (i32, i32) {
    %c0_i32 = arith.constant 0 : i32
    return %arg1, %arg2 : i32, i32
  }
  func.func @transform_5(%arg0: i32, %arg1: i32, %arg2: i32) -> (i32, i32) {
    %c0_i32 = arith.constant 0 : i32
    return %arg0, %arg1 : i32, i32
  }
}

</mosaic_0001>

<bundles_post_ra>
// kernel: tpu_custom_call.1
= control target key start
LH: loop header
LB: loop body
LE: loop exit
PB: predicated region body
PF: predicated region fallthrough
CT: control target
= control target key end

     0   :  { %vm45_vm0 = vcmask 261120   ;;  %v350_v2 = vmov 0.0|0.0   ;;  %vm351_vm2 = vmmov 0   ;;  %v352_v5 = vmov 0.0   ;;  %s480_s0 = inlined_call_operand.<no memory space> [shape: f32[1,1], index: 0, kind: input, shape index: {}]   ;;  %s481_s1 = inlined_call_operand.vmem [shape: f32[8,1], index: 1, kind: input, shape index: {}]   ;;  %s482_s2 = inlined_call_operand.vmem [shape: f32[1,128], index: 2, kind: input, shape index: {}]   ;;  %s483_s3 = inlined_call_operand.vmem [shape: f32[8,32], index: 3, kind: input, shape index: {}]   ;;  %s484_s4 = inlined_call_operand.vmem [shape: f32[128,32], index: 4, kind: input, shape index: {}]   ;;  %s485_s5 = inlined_call_operand.hbm [shape: f32[8,128], index: 5, kind: output, shape index: {}]  }
   0x1   :  { %v29_v0 = vld [vmem:[%s484_s4] sm:$0xff]  ;;  %v30_v1 = vld [vmem:[%s484_s4 + $0x8] sm:$0xff]  ;;  %286 = vmatprep.subr.bf16.mxu0 %v350_v2  ;;  %vm393_vm1 = vmpackc.low %vm45_vm0, %vm45_vm0  ;;  %283 = vmatprep.mubr.msk.f32.mxu0 %vm351_vm2, %v352_v5  ;;  %v353_v6 = vmov 0  }
   0x2   :  { %v287_v3 = vpack.c.bf16 %v30_v1, %v29_v0  ;;  %323 = vset.pattern.permute.xlu0 %v353_v6  ;;  %v31_v7 = vld [vmem:[%s484_s4 + $0x10] sm:$0xff]  ;;  %v32_v8 = vld [vmem:[%s484_s4 + $0x18] sm:$0xff]  ;;  %v172_v9 = vld [vmem:[%s481_s1] sm:$0xff] }
   0x4   :  { %289 = vmatpush3.bf16.xpose.msk.msra.mxu0 %vm393_vm1, %v287_v3 }
   0x5   :  { %290 = vmatprep.subr.bf16.mxu0 %v350_v2 }
   0x6   :  { %11 = vsyncpa [#allocation5], 0  ;;  %v291_v10 = vpack.c.bf16 %v32_v8, %v31_v7  ;;  %176 = vperm.xlu0 %323, %v172_v9   ;;  %v33_v11 = vld [vmem:[%s484_s4 + $0x20] sm:$0xff]  ;;  %v34_v12 = vld [vmem:[%s484_s4 + $0x28] sm:$0xff]  ;;  %v199_v43 = vstv %s480_s0 }
   0x7   :  { %v295_v13 = vpack.c.bf16 %v34_v12, %v33_v11  ;;  %v35_v14 = vld [vmem:[%s484_s4 + $0x30] sm:$0xff]  ;;  %v36_v15 = vld [vmem:[%s484_s4 + $0x38] sm:$0xff]  ;;  %v37_v17 = vld [vmem:[%s484_s4 + $0x40] sm:$0xff] }
   0x8   :  { %v299_v16 = vpack.c.bf16 %v36_v15, %v35_v14  ;;  %v38_v18 = vld [vmem:[%s484_s4 + $0x48] sm:$0xff]  ;;  %v39_v20 = vld [vmem:[%s484_s4 + $0x50] sm:$0xff]  ;;  %v40_v21 = vld [vmem:[%s484_s4 + $0x58] sm:$0xff] }
   0x9   :  { %v303_v19 = vpack.c.bf16 %v38_v18, %v37_v17  ;;  %v307_v22 = vpack.c.bf16 %v40_v21, %v39_v20  ;;  %v41_v23 = vld [vmem:[%s484_s4 + $0x60] sm:$0xff]  ;;  %v42_v24 = vld [vmem:[%s484_s4 + $0x68] sm:$0xff]  ;;  %v43_v26 = vld [vmem:[%s484_s4 + $0x70] sm:$0xff] }
   0xa   :  { %v311_v25 = vpack.c.bf16 %v42_v24, %v41_v23  ;;  %v44_v27 = vld [vmem:[%s484_s4 + $0x78] sm:$0xff]  ;;  %v28_v29 = vld [vmem:[%s483_s3] sm:$0xff] }
   0xb   :  { %v315_v28 = vpack.c.bf16 %v44_v27, %v43_v26  ;;  %v233_v30 = vld [vmem:[%s482_s2] ss:$0 sm:$0xff]  ;;  %s354_s2 = smov [#allocation4]  }
   0xc   :  { %293 = vmatpush3.bf16.xpose.msk.msra.mxu0 %vm393_vm1, %v291_v10  ;;  %s208_s30 = sshll.u32 %s354_s2, 4  ;;  %s209_s30 = int_to_ptr.vmem [resolvable:$true] %s208_s30 }
   0xd   :  { %294 = vmatprep.subr.bf16.mxu0 %v350_v2  ;;  %s326_s6 = scalar_lea.vmem %s209_s30, 128  ;;  %p331_p1 = scmp.lt.s32.totalorder %s209_s30, %s209_s30 }
   0xe   :  { %p327_p0 = scmp.ne.s32.totalorder %s209_s30, %s326_s6  ;;  %p332_p2 = scmp.lt.s32.totalorder %s326_s6, %s326_s6 }
  0x10   :  { %p333_p3 = por %p332_p2, %p331_p1 }
  0x12   :  { %p334_p4 = pnand %p333_p3, %p327_p0 }
  0x14   :  { %297 = vmatpush3.bf16.xpose.msk.msra.mxu0 %vm393_vm1, %v295_v13 }
  0x15   :  { %298 = vmatprep.subr.bf16.mxu0 %v350_v2 }
  0x1c   :  { %301 = vmatpush3.bf16.xpose.msk.msra.mxu0 %vm393_vm1, %v299_v16 }
  0x1d   :  { %302 = vmatprep.subr.bf16.mxu0 %v350_v2 }
  0x24   :  { %305 = vmatpush3.bf16.xpose.msk.msra.mxu0 %vm393_vm1, %v303_v19 }
  0x25   :  { %306 = vmatprep.subr.bf16.mxu0 %v350_v2 }
  0x2c   :  { %309 = vmatpush3.bf16.xpose.msk.msra.mxu0 %vm393_vm1, %v307_v22 }
  0x2d   :  { %310 = vmatprep.subr.bf16.mxu0 %v350_v2 }
  0x34   :  { %313 = vmatpush3.bf16.xpose.msk.msra.mxu0 %vm393_vm1, %v311_v25 }
  0x35   :  { %314 = vmatprep.subr.bf16.mxu0 %v350_v2 }
  0x3c   :  { %317 = vmatpush3.bf16.xpose.msk.msra.mxu0 %vm393_vm1, %v315_v28 }
  0x43   :  { %284 = vmatmul.mubr.msk.f32.vlgmr.msra.gmra.mrb[0].mxu0 %vm45_vm0, %v28_v29 }
  0x85   :  { %v177_v31 = vpop.permute.xlu0 %176 }
  0x86   :  { %v185_v32 = vadd.f32 %v233_v30, %v177_v31 }
 0x116   :  { %v163_v33 = vpop.f32.mrb[0].mxu0 }
 0x117   :  { %v187_v34 = vmul.f32 2.0, %v163_v33  ;;  %v285_v35 = vpop.f32.mrb[1].mxu0 }
 0x119   :  { %v188_v36 = vsub.f32 %v185_v32, %v187_v34 }
 0x11b   :  { %v189_v37 = vmax.f32 %v188_v36, 0.0 }
 0x11d   :  { %324 = vrsqrt.f32 %v189_v37  ;;  %vm192_vm3 = vcmp.eq.f32.partialorder %v189_v37, inf  ;;  %v195_v40 = vand.u32 2147483648, %v189_v37  ;;  %vm194_vm4 = vcmp.eq.f32.partialorder %v189_v37, 0.0 }
 0x127   :  { %v325_v38 = vpop.eup %324 }
 0x128   :  { %v191_v39 = vmul.f32 %v325_v38, %v189_v37 }
 0x12a   :  { %v193_v41 = vsel %vm192_vm3, %v189_v37, %v191_v39 }
 0x12b   :  { %v196_v42 = vsel %vm194_vm4, %v195_v40, %v193_v41 }
 0x12c   :  { %v197_v44 = vsub.f32 0.0, %v196_v42 }
 0x12e   :  { %v200_v45 = vmul.f32 %v199_v43, %v197_v44 }
 0x130   :  { %201 = vst [vmem:[#allocation4] sm:$0xff] %v200_v45 }
 0x131   :  { %337 = shalt.err (!%p334_p4)
}
 0x132   :  { %s338_s8 = scalar_lea.hbm %s485_s5, 128 }
 0x133   :  { %p339_p5 = scmp.ne.s32.totalorder %s485_s5, %s338_s8  ;;  %p342_p6 = scmp.lt.u32.totalorder %s338_s8, %s485_s5 }
 0x135   :  { %p344_p7 = pnand %p342_p6, %p339_p5 }
 0x137   :  { %347 = shalt.err (!%p344_p7)
}
 0x138   :  { %211 = dma.vmem_to_hbm [thread:$0]  %s209_s30, 128, %s485_s5, [#allocation5]  }
 0x139   :  { %348 = dma.done.wait [#allocation5], 128  }
 0x13a   :  { %349 = vsyncadd [#allocation5], 4294967168 }
 0x13b   :  { %215 = vsyncpa [#allocation5], 1 }

</bundles_post_ra>
